<compile_context>
chip_gen: v6e
topology: v6e:2x2x1
jax: 0.10.0
libtpu: 0.0.40
codegen_flags: <defaults>
</compile_context>

<pallas_src>
import functools

import numpy as np
import jax
import jax.numpy as jnp
from jax.experimental import pallas as pl
from jax.experimental.pallas import tpu as pltpu


def _round_up(x, m):
    return (x + m - 1) // m * m


def _cdiv(a, b):
    return (a + b - 1) // b


def _align_lane(d):
    # 256-align for v6e/v7x's 2x256x256 MXUs; 128 suffices for small dims
    # (and matches v5e's 4x128x128 MXU).
    return _round_up(d, 256) if d > 128 else _round_up(d, 128)


def _vmem_limit_bytes():
    try:
        cap = int(pltpu.get_tpu_info().vmem_capacity_bytes)
    except Exception:
        cap = 64 * 1024 * 1024  # conservative fallback = v7x physical VMEM
    # Leave headroom below physical capacity on every generation.
    return min(cap * 3 // 4, 112 * 1024 * 1024)


def _patch_embed_kernel(x_ref, w_ref, b_ref, o_ref):
    # x_ref: (tm, Kp) bf16 patches tile, w_ref: (Kp, tn) bf16 projection,
    # b_ref: (1, tn) f32 bias. Accumulate on the MXU in f32, bias-add in f32.
    acc = jnp.dot(x_ref[...], w_ref[...], preferred_element_type=jnp.float32)
    o_ref[...] = (acc + b_ref[...]).astype(o_ref.dtype)


def patch_embed_matmul(patches, weight, bias, *, out_dtype, tm_max=1024):
    """patches: (M, K), weight: (K, N), bias: (N,) -> (M, N) in out_dtype."""
    M, K = patches.shape
    N = weight.shape[1]
    in_bytes = np.dtype(patches.dtype).itemsize
    w_bytes = np.dtype(weight.dtype).itemsize
    out_bytes = np.dtype(out_dtype).itemsize

    Kp = _align_lane(K)
    Nal = _align_lane(N)

    vmem_limit = _vmem_limit_bytes()
    budget = vmem_limit - 4 * 1024 * 1024  # margin for Mosaic internal scratch

    # --- N tiling: keep weight + output blocks within the VMEM budget. -----
    grid_n = 1
    while True:
        tn = _round_up(_cdiv(Nal, grid_n), 128)
        w_bufs = 1 if grid_n == 1 else 2        # invariant weight -> 1 buffer
        fixed = w_bufs * (Kp * tn * w_bytes + tn * 4)
        need_min = fixed + 2 * 8 * (Kp * in_bytes + tn * out_bytes)
        if need_min <= budget or tn == 128:
            break
        grid_n += 1
    Np = grid_n * tn

    # --- M tiling: largest tm that fits, then balance across grid steps. ---
    per_row = 2 * (Kp * in_bytes + tn * out_bytes)  # double-buffered in/out
    tm_cap = max(8, min(tm_max, ((budget - fixed) // per_row) // 8 * 8))
    grid_m = _cdiv(M, tm_cap)
    if grid_m == 1 and M >= 128:
        grid_m = 2  # v7x: make sure both TensorCores get a row-tile
    tm = _round_up(_cdiv(M, grid_m), 8)
    Mp = grid_m * tm

    # Zero padding (contributes zero to the dot product; padded rows/cols are
    # sliced off below). With allow_input_fusion these pads fuse into the
    # kernel's input reads rather than costing an HBM pass.
    if Mp != M or Kp != K:
        patches_p = jnp.pad(patches, ((0, Mp - M), (0, Kp - K)))
    else:
        patches_p = patches
    if Kp != K or Np != N:
        weight_p = jnp.pad(weight, ((0, Kp - K), (0, Np - N)))
    else:
        weight_p = weight
    bias_p = jnp.pad(bias.astype(jnp.float32), (0, Np - N)).reshape(1, Np)

    # Grid-invariant operands: single-buffer them (they are fetched once).
    if grid_n == 1:
        w_spec = pl.BlockSpec((Kp, tn), lambda i, j: (0, j),
                              pipeline_mode=pl.Buffered(1))
        b_spec = pl.BlockSpec((1, tn), lambda i, j: (0, j),
                              pipeline_mode=pl.Buffered(1))
    else:
        w_spec = pl.BlockSpec((Kp, tn), lambda i, j: (0, j))
        b_spec = pl.BlockSpec((1, tn), lambda i, j: (0, j))

    cost = pl.CostEstimate(
        flops=2 * Mp * Kp * Np,
        transcendentals=0,
        bytes_accessed=int(Mp * Kp * in_bytes + Kp * Np * w_bytes
                           + Np * 4 + Mp * Np * out_bytes),
    )

    out = pl.pallas_call(
        _patch_embed_kernel,
        out_shape=jax.ShapeDtypeStruct((Mp, Np), out_dtype),
        grid_spec=pltpu.PrefetchScalarGridSpec(
            num_scalar_prefetch=0,
            grid=(grid_m, grid_n),
            in_specs=[
                # Patch rows stream tile-by-tile along M (double-buffered).
                pl.BlockSpec((tm, Kp), lambda i, j: (i, 0)),
                w_spec,
                b_spec,
            ],
            out_specs=pl.BlockSpec((tm, tn), lambda i, j: (i, j)),
        ),
        compiler_params=pltpu.CompilerParams(
            dimension_semantics=("parallel", "parallel"),
            vmem_limit_bytes=int(vmem_limit),
            # Let XLA fuse the im2col cast/transpose/pad (and the weight
            # transpose) into the kernel inputs instead of materializing them
            # as a separate HBM pass.
            allow_input_fusion=[True, True, True],
        ),
        cost_estimate=cost,
    )(patches_p, weight_p, bias_p)

    if Mp != M or Np != N:
        out = out[:M, :N]   # no-op (elided) when no padding was needed
    return out


def patch_embed_forward(x, conv_weight, conv_bias, patch_size,
                        compute_dtype=jnp.bfloat16, out_dtype=None,
                        tm_max=1024):
    """Equivalent of PatchEmbed.forward.

    x:           [B, C, H, W]            (NCHW, like PyTorch)
    conv_weight: [embed_dim, C, ph, pw]  (PyTorch Conv2d weight layout)
    conv_bias:   [embed_dim]
    out_dtype:   defaults to x.dtype; pass jnp.bfloat16 when the downstream
                 consumer accepts it (halves the dominant output HBM stream).
    returns:     [B, num_patches, embed_dim]
    """
    B, C, H, W = x.shape
    ph, pw = patch_size
    embed_dim = conv_weight.shape[0]
    assert H % ph == 0 and W % pw == 0
    Hp, Wp = H // ph, W // pw
    num_patches = Hp * Wp
    if out_dtype is None:
        out_dtype = x.dtype

    # im2col. Cast first so that, even if XLA does not fuse this layout pass
    # into the kernel input (allow_input_fusion), it moves bf16 rather than
    # f32. [B,C,Hp,ph,Wp,pw] -> [B,Hp,Wp,C,ph,pw] -> [B*Np, C*ph*pw]
    xc = x.astype(compute_dtype)
    patches = xc.reshape(B, C, Hp, ph, Wp, pw)
    patches = jnp.transpose(patches, (0, 2, 4, 1, 3, 5))
    patches = patches.reshape(B * num_patches, C * ph * pw)

    # Conv weight [E, C, ph, pw] -> matmul weight [C*ph*pw, E] (same flatten
    # order as the patches above).
    w = conv_weight.reshape(embed_dim, C * ph * pw).T.astype(compute_dtype)

    out = patch_embed_matmul(patches, w, conv_bias, out_dtype=out_dtype,
                             tm_max=tm_max)
    return out.reshape(B, num_patches, embed_dim)


if __name__ == "__main__":
    # Small config consistent with the module: img 16x16, patch 4, C=4, E=32.
    B, C, H, W = 2, 4, 16, 16
    patch = (4, 4)
    embed_dim = 32

    key = jax.random.PRNGKey(0)
    kx, kw, kb = jax.random.split(key, 3)
    x = jax.random.normal(kx, (B, C, H, W), dtype=jnp.float32)
    conv_weight = jax.random.normal(kw, (embed_dim, C, patch[0], patch[1]),
                                    dtype=jnp.float32) * 0.02
    conv_bias = jax.random.normal(kb, (embed_dim,), dtype=jnp.float32) * 0.01

    fwd = jax.jit(functools.partial(patch_embed_forward, patch_size=patch))
    out = jax.block_until_ready(fwd(x, conv_weight, conv_bias))

    # Reference: lax conv (same semantics as nn.Conv2d stride=patch),
    # then flatten(2).transpose(1, 2).
    ref = jax.lax.conv_general_dilated(
        x, conv_weight, window_strides=patch, padding="VALID",
        dimension_numbers=("NCHW", "OIHW", "NCHW"))
    ref = ref + conv_bias[None, :, None, None]
    ref = ref.reshape(B, embed_dim, -1).transpose(0, 2, 1)

    assert out.shape == (B, (H // patch[0]) * (W // patch[1]), embed_dim)
    # bf16 operands with f32 accumulation -> bf16-appropriate tolerance.
    assert jnp.allclose(out, ref, atol=2e-2, rtol=2e-2)
    print("KERNEL_OK")
</pallas_src>

<mosaic_0001>
module attributes {stable_mosaic.version = 11 : i64} {
  func.func @_patch_embed_kernel(%arg0: i32, %arg1: i32, %arg2: memref<32x128xbf16, #tpu.memory_space<vmem>>, %arg3: memref<128x128xbf16, #tpu.memory_space<vmem>>, %arg4: memref<1x128xf32, #tpu.memory_space<vmem>>, %arg5: memref<32x128xf32, #tpu.memory_space<vmem>>) attributes {dimension_semantics = [#tpu.dimension_semantics<parallel>, #tpu.dimension_semantics<parallel>], iteration_bounds = array<i64: 1, 1>, scalar_prefetch = 0 : i64, scratch_operands = 0 : i64, tpu.core_type = #tpu.core_type<tc>, window_params = [{transform_indices = @transform_0, window_bounds = array<i64: 32, 128>}, {pipeline_mode = #tpu.pipeline_mode<synchronous>, transform_indices = @transform_1, window_bounds = array<i64: 128, 128>}, {pipeline_mode = #tpu.pipeline_mode<synchronous>, transform_indices = @transform_2, window_bounds = array<i64: 1, 128>}, {transform_indices = @transform_3, window_bounds = array<i64: 32, 128>}]} {
    %c0 = arith.constant 0 : index
    %c0_0 = arith.constant 0 : index
    %0 = vector.load %arg2[%c0, %c0_0] : memref<32x128xbf16, #tpu.memory_space<vmem>>, vector<32x128xbf16>
    %c0_1 = arith.constant 0 : index
    %c0_2 = arith.constant 0 : index
    %1 = vector.load %arg3[%c0_1, %c0_2] : memref<128x128xbf16, #tpu.memory_space<vmem>>, vector<128x128xbf16>
    %cst = arith.constant dense<0.000000e+00> : vector<32x128xf32>
    %2 = tpu.matmul %0, %1, %cst {dimension_numbers = #tpu.dot_dimension_numbers<[1], [0], [0], [1], [0, 0, 1, 1], [], []>} : vector<32x128xbf16>, vector<128x128xbf16>, vector<32x128xf32> -> vector<32x128xf32>
    %c0_3 = arith.constant 0 : index
    %c0_4 = arith.constant 0 : index
    %3 = vector.load %arg4[%c0_3, %c0_4] : memref<1x128xf32, #tpu.memory_space<vmem>>, vector<1x128xf32>
    %4 = vector.broadcast %3 : vector<1x128xf32> to vector<32x128xf32>
    %5 = arith.addf %2, %4 : vector<32x128xf32>
    %c0_5 = arith.constant 0 : index
    %c0_6 = arith.constant 0 : index
    %6 = vector.load %arg5[%c0_5, %c0_6] : memref<32x128xf32, #tpu.memory_space<vmem>>, vector<32x128xf32>
    tpu.vector_store %arg5[%c0_5, %c0_6], %5 {strides = array<i32>} : memref<32x128xf32, #tpu.memory_space<vmem>>, vector<32x128xf32>,
    return
  }
  func.func @transform_0(%arg0: i32, %arg1: i32) -> (i32, i32) {
    %c0_i32 = arith.constant 0 : i32
    %c0_i32_0 = arith.constant 0 : i32
    return %arg0, %c0_i32 : i32, i32
  }
  func.func @transform_1(%arg0: i32, %arg1: i32) -> (i32, i32) {
    %c0_i32 = arith.constant 0 : i32
    %c0_i32_0 = arith.constant 0 : i32
    return %c0_i32, %arg1 : i32, i32
  }
  func.func @transform_2(%arg0: i32, %arg1: i32) -> (i32, i32) {
    %c0_i32 = arith.constant 0 : i32
    %c0_i32_0 = arith.constant 0 : i32
    return %c0_i32, %arg1 : i32, i32
  }
  func.func @transform_3(%arg0: i32, %arg1: i32) -> (i32, i32) {
    %c0_i32 = arith.constant 0 : i32
    return %arg0, %arg1 : i32, i32
  }
}

</mosaic_0001>

<bundles_post_ra>
// kernel: patch_embed_forward.2
= control target key start
LH: loop header
LB: loop body
LE: loop exit
PB: predicated region body
PF: predicated region fallthrough
CT: control target
= control target key end

     0   :  { %s698_s0 = inlined_call_operand.vmem [shape: bf16[64,32], index: 0, kind: input, shape index: {}]   ;;  %s699_s1 = inlined_call_operand.<no memory space> [shape: bf16[], index: 1, kind: input, shape index: {}]   ;;  %s700_s2 = inlined_call_operand.vmem [shape: bf16[32,64], index: 2, kind: input, shape index: {}]   ;;  %s701_s3 = inlined_call_operand.vmem [shape: f32[32], index: 3, kind: input, shape index: {}]   ;;  %s702_s4 = inlined_call_operand.<no memory space> [shape: f32[], index: 4, kind: input, shape index: {}]   ;;  %s703_s5 = inlined_call_operand.hbm [shape: f32[32,128], index: 5, kind: output, shape index: {}]  }
   0x1   :  { %v10_v0 = vstv %s699_s1  ;;  %v20_v1 = vstv %s702_s4 }
   0x2   :  { %v11_v2 = vunpack.i.l.bf16 %v10_v0 }
   0x3   :  { %v40_v4 = vlaneseq  ;;  %v513_v5 = vld [vmem:[%s698_s0 + $0x18] sm:$0xff]   ;;  %v511_v6 = vld [vmem:[%s698_s0 + $0x10] sm:$0xff]   ;;  %v509_v7 = vld [vmem:[%s698_s0 + $0x8] sm:$0xff]  }
   0x4   :  { %v529_v3 = vpack.c.bf16 %v11_v2, %v11_v2  ;;  %v265_v8 = vunpack.c.l.bf16 %v513_v5  ;;  %v288_v9 = vunpack.c.h.bf16 %v513_v5  ;;  %v219_v10 = vunpack.c.l.bf16 %v511_v6  ;;  %v127_v12 = vld [vmem:[%s698_s0] sm:$0xff]   ;;  %v506_v14 = vld [vmem:[%s700_s2 + $0x8] sm:$0xff]  }
   0x5   :  { %v242_v11 = vunpack.c.h.bf16 %v511_v6  ;;  %v37_v13 = vld [vmem:[%s700_s2] sm:$0xff]   ;;  %v41_v15 = vand.u32 127, %v40_v4  ;;  %v173_v16 = vunpack.c.l.bf16 %v509_v7  ;;  %v196_v17 = vunpack.c.h.bf16 %v509_v7 }
   0x6   :  { %545 = vst [vmem:[#allocation20 + $0x38] sm:$0xff] %v529_v3   ;;  %530 = vst [vmem:[#allocation20 + $0x20] sm:$0xff] %v529_v3   ;;  %v128_v18 = vunpack.c.l.bf16 %v127_v12 }
   0x7   :  { %535 = vst [vmem:[#allocation20 + $0x28] sm:$0xff] %v529_v3   ;;  %540 = vst [vmem:[#allocation20 + $0x30] sm:$0xff] %v529_v3  }
   0x8   :  { %21 = vsyncpa [#allocation18], 0  ;;  %v150_v19 = vunpack.c.h.bf16 %v127_v12  ;;  %v38_v20 = vunpack.c.l.bf16 %v37_v13  ;;  %v60_v21 = vunpack.c.h.bf16 %v37_v13  ;;  %v83_v22 = vunpack.c.l.bf16 %v506_v14  ;;  %v340_v42 = vld [vmem:[%s701_s3] sm:$0x1]  ;;  %s613_s4 = smov [#allocation17]  }
   0x9   :  { %vm133_vm0 = vcmp.lt.s32.totalorder %v41_v15, 32  ;;  %vm43_vm1 = vcmp.lt.s32.totalorder %v41_v15, 64  ;;  %v106_v23 = vunpack.c.h.bf16 %v506_v14  ;;  %vm670_vm2 = vcmp.lt.s32.totalorder %v40_v4, 32  ;;  %s494_s9 = sshll.u32 %s613_s4, 4  ;;  %s495_s9 = int_to_ptr.vmem [resolvable:$true] %s494_s9 }
   0xa   :  { %v271_v25 = vsel %vm133_vm0, %v265_v8, %v11_v2  ;;  %v294_v26 = vsel %vm133_vm0, %v288_v9, %v11_v2  ;;  %v225_v27 = vsel %vm133_vm0, %v219_v10, %v11_v2  ;;  %v248_v28 = vsel %vm133_vm0, %v242_v11, %v11_v2  ;;  %s590_s10 = scalar_lea.vmem %s495_s9, 512  ;;  %p595_p1 = scmp.lt.s32.totalorder %s495_s9, %s495_s9 }
   0xb   :  { %v612_v29 = vmov 0.0   ;;  %v179_v34 = vsel %vm133_vm0, %v173_v16, %v11_v2  ;;  %v202_v35 = vsel %vm133_vm0, %v196_v17, %v11_v2  ;;  %v134_v36 = vsel %vm133_vm0, %v128_v18, %v11_v2  ;;  %p591_p0 = scmp.ne.s32.totalorder %s495_s9, %s590_s10  ;;  %p596_p2 = scmp.lt.s32.totalorder %s590_s10, %s590_s10 }
   0xc   :  { %v273_v30 = vpack.c.bf16 %v612_v29, %v271_v25  ;;  %v296_v31 = vpack.c.bf16 %v612_v29, %v294_v26  ;;  %v227_v32 = vpack.c.bf16 %v612_v29, %v225_v27  ;;  %v250_v33 = vpack.c.bf16 %v612_v29, %v248_v28 }
   0xd   :  { %v156_v37 = vsel %vm133_vm0, %v150_v19, %v11_v2  ;;  %v181_v38 = vpack.c.bf16 %v612_v29, %v179_v34  ;;  %v204_v39 = vpack.c.bf16 %v612_v29, %v202_v35  ;;  %v135_v40 = vpack.c.bf16 %v612_v29, %v134_v36  ;;  %v580_v43 = vld [vmem:[#allocation20 + $0x38] sm:$0xff]   ;;  %v583_v55 = vld [vmem:[#allocation20 + $0x20] sm:$0xff]   ;;  %p597_p3 = por %p596_p2, %p595_p1 }
   0xe   :  { %276 = vst [vmem:[#allocation20 + $0x18] sm:$0xf] %v273_v30  ;;  %299 = vst [vmem:[#allocation20 + $0x1c] sm:$0xf] %v296_v31  ;;  %v158_v41 = vpack.c.bf16 %v612_v29, %v156_v37  ;;  %v44_v44 = vsel %vm43_vm1, %v38_v20, %v11_v2  ;;  %v66_v45 = vsel %vm43_vm1, %v60_v21, %v11_v2  ;;  %v581_v48 = vld [vmem:[#allocation20 + $0x30] sm:$0xff]   ;;  %556 = vmatprep.subr.bf16.mxu0 %v580_v43  ;;  %v582_v54 = vld [vmem:[#allocation20 + $0x28] sm:$0xff]  }
   0xf   :  { %230 = vst [vmem:[#allocation20 + $0x10] sm:$0xf] %v227_v32  ;;  %253 = vst [vmem:[#allocation20 + $0x14] sm:$0xf] %v250_v33  ;;  %v89_v46 = vsel %vm43_vm1, %v83_v22, %v11_v2  ;;  %v112_v47 = vsel %vm43_vm1, %v106_v23, %v11_v2  ;;  %v45_v49 = vpack.c.bf16 %v612_v29, %v44_v44  ;;  %557 = vmatpush3.bf16.msra.mxu0 %v580_v43  ;;  %p598_p4 = pnand %p597_p3, %p591_p0 }
  0x10   :  { %184 = vst [vmem:[#allocation20 + $0x8] sm:$0xf] %v181_v38  ;;  %207 = vst [vmem:[#allocation20 + $0xc] sm:$0xf] %v204_v39  ;;  %v68_v50 = vpack.c.bf16 %v612_v29, %v66_v45  ;;  %v91_v51 = vpack.c.bf16 %v612_v29, %v89_v46  ;;  %v114_v52 = vpack.c.bf16 %v612_v29, %v112_v47  ;;  %558 = vmatprep.subr.bf16.mxu0 %v581_v48 }
  0x11   :  { %138 = vst [vmem:[#allocation20] sm:$0xf] %v135_v40  ;;  %161 = vst [vmem:[#allocation20 + $0x4] sm:$0xf] %v158_v41  ;;  %v344_v53 = vsel %vm670_vm2, %v340_v42, %v20_v1 }
  0x12   :  { %48 = vst [vmem:[#allocation19] sm:$0xf] %v45_v49  ;;  %71 = vst [vmem:[#allocation19 + $0x4] sm:$0xf] %v68_v50 }
  0x13   :  { %94 = vst [vmem:[#allocation19 + $0x8] sm:$0xf] %v91_v51  ;;  %117 = vst [vmem:[#allocation19 + $0xc] sm:$0xf] %v114_v52  ;;  %559 = vmatpush3.bf16.msra.mxu0 %v581_v48 }
  0x14   :  { %347 = vst [vmem:[#allocation21] sm:$0x1] %v344_v53  ;;  %560 = vmatprep.subr.bf16.mxu0 %v582_v54 }
  0x15   :  { %v584_v57 = vld [vmem:[#allocation20 + $0x18] sm:$0xff]  }
  0x16   :  { %v585_v58 = vld [vmem:[#allocation20 + $0x10] sm:$0xff]  }
  0x17   :  { %561 = vmatpush3.bf16.msra.mxu0 %v582_v54  ;;  %v586_v59 = vld [vmem:[#allocation20 + $0x8] sm:$0xff]  }
  0x18   :  { %562 = vmatprep.subr.bf16.mxu0 %v583_v55  ;;  %v587_v60 = vld [vmem:[#allocation20] sm:$0xff]  }
  0x19   :  { %v588_v56 = vld [vmem:[#allocation19] sm:$0xff]  }
  0x1a   :  { %572 = vmatprep.mubr.bf16.mxu0 %v588_v56  ;;  %v589_v61 = vld [vmem:[#allocation19 + $0x8] sm:$0xff]  }
  0x1b   :  { %563 = vmatpush3.bf16.msra.mxu0 %v583_v55  ;;  %v515_v62 = vld [vmem:[#allocation21] ss:$0 sm:$0xff] }
  0x1c   :  { %564 = vmatprep.subr.bf16.mxu0 %v584_v57 }
  0x1f   :  { %565 = vmatpush3.bf16.msra.mxu0 %v584_v57 }
  0x20   :  { %566 = vmatprep.subr.bf16.mxu0 %v585_v58 }
  0x23   :  { %567 = vmatpush3.bf16.msra.mxu0 %v585_v58 }
  0x24   :  { %568 = vmatprep.subr.bf16.mxu0 %v586_v59 }
  0x27   :  { %569 = vmatpush3.bf16.msra.mxu0 %v586_v59 }
  0x28   :  { %570 = vmatprep.subr.bf16.mxu0 %v587_v60 }
  0x2b   :  { %571 = vmatpush3.bf16.msra.mxu0 %v587_v60 }
  0x2e   :  { %573 = vmatmul.mubr.bf16.vlgmr.msra.gmra.mxu0 %v589_v61 }
  0xee   :  { %v574_v63 = vpop.f32.mrf.mxu0 }
  0xef   :  { %v479_v0 = vadd.f32 %v574_v63, %v515_v62 }
  0xf0   :  { %v470_v1 = vpop.f32.mrf.mxu0 }
  0xf1   :  { %487 = vst [vmem:[#allocation17 + $0x10] sm:$0xff] %v479_v0  ;;  %v471_v2 = vadd.f32 %v515_v62, %v470_v1 }
  0xf2   :  { %v575_v3 = vpop.f32.mrf.mxu0 }
  0xf3   :  { %485 = vst [vmem:[#allocation17] sm:$0xff] %v471_v2  ;;  %v482_v4 = vadd.f32 %v575_v3, %v515_v62 }
  0xf4   :  { %v473_v5 = vpop.f32.mrf.mxu0 }
  0xf5   :  { %488 = vst [vmem:[#allocation17 + $0x18] sm:$0xff] %v482_v4  ;;  %v474_v6 = vadd.f32 %v515_v62, %v473_v5 }
  0xf7   :  { %486 = vst [vmem:[#allocation17 + $0x8] sm:$0xff] %v474_v6 }
  0xf8   :  { %601 = shalt.err (!%p598_p4)
}
  0xf9   :  { %s614_s11 = smov 128   ;;  %s615_s12 = smov 8  }
  0xfa   :  { %500 = dma.vmem_to_hbm [thread:$0]  %s495_s9, 512, %s703_s5, [#allocation18], %s614_s11, %s614_s11, %s615_s12  }
  0xfb   :  { %610 = dma.done.wait [#allocation18], 512  }
  0xfc   :  { %611 = vsyncadd [#allocation18], 4294966784 }
  0xfd   :  { %504 = vsyncpa [#allocation18], 1 }

</bundles_post_ra>
